<compile_context>
chip_gen: v6e
topology: v6e:2x2x1
jax: 0.10.0
libtpu: 0.0.40
codegen_flags: <defaults>
</compile_context>

<pallas_src>
import functools

import jax
import jax.numpy as jnp
from jax.experimental import pallas as pl
from jax.experimental.pallas import tpu as pltpu

EPS = 1e-5


def _conv_pool_stats_kernel(w_ref, b_ref, xe_ref, xo_ref, y_ref, st_ref, *, KH, W, Lh):
    """Per sample: Conv2d((KH,1)) -> +bias -> ReLU -> MaxPool((2,1)) -> per-channel sum/sumsq.

    w_ref : (KH, C_out, C_in)  bf16   folded conv taps
    b_ref : (C_out, 1)         f32    conv bias
    xe_ref: (C_in, (H//2)*W)   bf16   even input rows of this sample, (h2, w) flattened
    xo_ref: (C_in, (H//2)*W)   bf16   odd  input rows of this sample
    y_ref : (C_out, Hp*W)      f32    pooled + ReLU activations for this sample
    st_ref: (C_out, 2)         f32    [sum, sumsq] over this sample's Hp*W positions
    """
    C_out = w_ref.shape[1]
    acc_e = jnp.zeros((C_out, Lh), jnp.float32)   # conv rows 2h'
    acc_o = jnp.zeros((C_out, Lh), jnp.float32)   # conv rows 2h'+1
    for kh in range(KH):                          # static unroll: KH accumulating matmuls/branch
        a, r = divmod(kh, 2)
        wk = w_ref[kh]                            # (C_out, C_in)
        if r == 0:
            src_e = xe_ref[:, a * W:a * W + Lh]                  # input row 2(h'+a)   = 2h'+kh
            src_o = xo_ref[:, a * W:a * W + Lh]                  # input row 2(h'+a)+1 = 2h'+1+kh
        else:
            src_e = xo_ref[:, a * W:a * W + Lh]                  # input row 2(h'+a)+1 = 2h'+kh
            src_o = xe_ref[:, (a + 1) * W:(a + 1) * W + Lh]      # input row 2(h'+a+1) = 2h'+1+kh
        acc_e += jnp.dot(wk, src_e, preferred_element_type=jnp.float32)
        acc_o += jnp.dot(wk, src_o, preferred_element_type=jnp.float32)

    # MaxPool2d((2,1)); +bias and ReLU are monotone & per-channel, so they commute with the max.
    y = jnp.maximum(jnp.maximum(acc_e, acc_o) + b_ref[...], 0.0)
    y_ref[...] = y
    st_ref[...] = jnp.concatenate(
        [jnp.sum(y, axis=1, keepdims=True), jnp.sum(y * y, axis=1, keepdims=True)], axis=1)


def _bn_apply_kernel(ab_ref, y_ref, o_ref):
    # ab_ref: (C_out, 2) = [scale, shift];  y_ref / o_ref: (C_out, Hp*W)
    o_ref[...] = y_ref[...] * ab_ref[:, 0:1] + ab_ref[:, 1:2]


@jax.jit
def conv_block(x, weight, bias, gamma, beta):
    """x: (N, C_in, H, W); weight: (C_out, C_in, KH, 1) [PyTorch Conv2d layout]."""
    N, C_in, H, W = x.shape
    C_out, C_in_w, KH, KW = weight.shape
    assert C_in_w == C_in and KW == 1
    assert H % 2 == 0                      # needed for the even/odd MaxPool pairing
    Hc = H - KH + 1                        # conv output height (padding=0)
    assert Hc % 2 == 0                     # TODO(synk): odd Hc (MaxPool floor drop) not handled
    Hp = Hc // 2                           # pooled height
    Lh = Hp * W                            # pooled positions per sample
    HW2 = (H // 2) * W                     # columns per even/odd half

    # Even/odd row split (the MaxPool pairing), (h2, w) flattened onto the lane axis.
    # bf16 matmul operands (f32 accumulate in-kernel); total bytes == x, not KH*x.
    xe = x[:, :, 0::2, :].reshape(N, C_in, HW2).astype(jnp.bfloat16)
    xo = x[:, :, 1::2, :].reshape(N, C_in, HW2).astype(jnp.bfloat16)
    w = jnp.transpose(weight[:, :, :, 0], (2, 0, 1)).astype(jnp.bfloat16)    # (KH, C_out, C_in)
    b2 = bias.reshape(C_out, 1).astype(jnp.float32)

    k1 = functools.partial(_conv_pool_stats_kernel, KH=KH, W=W, Lh=Lh)
    y, stats = pl.pallas_call(
        k1,
        out_shape=(jax.ShapeDtypeStruct((N, C_out, Lh), jnp.float32),
                   jax.ShapeDtypeStruct((N, C_out, 2), jnp.float32)),
        grid=(N,),
        in_specs=[
            pl.BlockSpec((KH, C_out, C_in), lambda n: (0, 0, 0)),
            pl.BlockSpec((C_out, 1), lambda n: (0, 0)),
            pl.BlockSpec((None, C_in, HW2), lambda n: (n, 0, 0)),
            pl.BlockSpec((None, C_in, HW2), lambda n: (n, 0, 0)),
        ],
        out_specs=(
            pl.BlockSpec((None, C_out, Lh), lambda n: (n, 0, 0)),
            pl.BlockSpec((None, C_out, 2), lambda n: (n, 0, 0)),
        ),
        compiler_params=pltpu.CompilerParams(dimension_semantics=("parallel",)),
    )(w, b2, xe, xo)

    # Global training-mode BN statistics (biased variance) -- tiny fused reduction.
    count = jnp.float32(N * Lh)
    s = jnp.sum(stats[:, :, 0], axis=0)
    ss = jnp.sum(stats[:, :, 1], axis=0)
    mean = s / count
    var = ss / count - mean * mean
    scale = gamma.astype(jnp.float32) * jax.lax.rsqrt(var + EPS)
    shift = beta.astype(jnp.float32) - mean * scale
    ab = jnp.stack([scale, shift], axis=1)                                   # (C_out, 2)

    out = pl.pallas_call(
        _bn_apply_kernel,
        out_shape=jax.ShapeDtypeStruct((N, C_out, Lh), jnp.float32),
        grid=(N,),
        in_specs=[
            pl.BlockSpec((C_out, 2), lambda n: (0, 0)),
            pl.BlockSpec((None, C_out, Lh), lambda n: (n, 0, 0)),
        ],
        out_specs=pl.BlockSpec((None, C_out, Lh), lambda n: (n, 0, 0)),
        compiler_params=pltpu.CompilerParams(dimension_semantics=("parallel",)),
    )(ab, y)

    # (N, C_out, Hp*W) -> (N, C_out, Hp, W): contiguous reshape, no transpose pass.
    return out.reshape(N, C_out, Hp, W)


def _reference(x, weight, bias, gamma, beta):
    """Pure-JAX f32 ConvBlock: Conv2d(k=(5,1),pad=0) -> ReLU -> MaxPool2d((2,1)) -> BN (train)."""
    N, C_in, H, W = x.shape
    C_out, _, KH, _ = weight.shape
    Hc = H - KH + 1
    out = jnp.zeros((N, C_out, Hc, W), jnp.float32)
    for kh in range(KH):
        out = out + jnp.einsum("nchw,oc->nohw", x[:, :, kh:kh + Hc, :], weight[:, :, kh, 0])
    out = jnp.maximum(out + bias[None, :, None, None], 0.0)
    Hp = Hc // 2
    out = out[:, :, :Hp * 2, :].reshape(N, C_out, Hp, 2, W).max(axis=3)
    mean = out.mean(axis=(0, 2, 3), keepdims=True)
    var = ((out - mean) ** 2).mean(axis=(0, 2, 3), keepdims=True)
    return ((out - mean) / jnp.sqrt(var + EPS)
            * gamma[None, :, None, None] + beta[None, :, None, None])


if __name__ == "__main__":
    in_channels, out_channels = 4, 8
    N, H, W = 2, 16, 16

    key = jax.random.PRNGKey(0)
    kx, kw, kb = jax.random.split(key, 3)
    x = jax.random.normal(kx, (N, in_channels, H, W), jnp.float32)
    # Conv2d weight layout: (out_channels, in_channels, kH, kW)
    weight = jax.random.normal(kw, (out_channels, in_channels, 5, 1), jnp.float32) * 0.1
    bias = jax.random.normal(kb, (out_channels,), jnp.float32) * 0.1
    gamma = jnp.ones((out_channels,), jnp.float32)   # BatchNorm2d default init
    beta = jnp.zeros((out_channels,), jnp.float32)

    out = conv_block(x, weight, bias, gamma, beta)
    out = jax.block_until_ready(out)

    ref = _reference(x, weight, bias, gamma, beta)
    assert out.shape == (N, out_channels, (H - 4) // 2, W), out.shape
    # bf16 MXU operands (f32 accumulate) vs. the f32 reference -> loosened tolerance.
    err = float(jnp.max(jnp.abs(out - ref)))
    assert jnp.allclose(out, ref, atol=5e-2, rtol=5e-2), err

    print("KERNEL_OK")
</pallas_src>

<mosaic_0001>
module attributes {stable_mosaic.version = 11 : i64} {
  func.func @_conv_pool_stats_kernel(%arg0: i32, %arg1: memref<5x8x4xbf16, #tpu.memory_space<vmem>>, %arg2: memref<8x1xf32, #tpu.memory_space<vmem>>, %arg3: memref<1x4x128xbf16, #tpu.memory_space<vmem>>, %arg4: memref<1x4x128xbf16, #tpu.memory_space<vmem>>, %arg5: memref<1x8x96xf32, #tpu.memory_space<vmem>>, %arg6: memref<1x8x2xf32, #tpu.memory_space<vmem>>) attributes {dimension_semantics = [#tpu.dimension_semantics<parallel>], iteration_bounds = array<i64: 2>, scalar_prefetch = 0 : i64, scratch_operands = 0 : i64, tpu.core_type = #tpu.core_type<tc>, window_params = [{pipeline_mode = #tpu.pipeline_mode<synchronous>, transform_indices = @transform_0, window_bounds = array<i64: 5, 8, 4>}, {pipeline_mode = #tpu.pipeline_mode<synchronous>, transform_indices = @transform_1, window_bounds = array<i64: 8, 1>}, {transform_indices = @transform_2, window_bounds = array<i64: 1, 4, 128>}, {transform_indices = @transform_3, window_bounds = array<i64: 1, 4, 128>}, {transform_indices = @transform_4, window_bounds = array<i64: 1, 8, 96>}, {transform_indices = @transform_5, window_bounds = array<i64: 1, 8, 2>}]} {
    %cst = arith.constant 0.000000e+00 : f32
    %0 = vector.broadcast %cst : f32 to vector<8x96xf32>
    %cst_0 = arith.constant 0.000000e+00 : f32
    %1 = vector.broadcast %cst_0 : f32 to vector<8x96xf32>
    %c0 = arith.constant 0 : index
    %c0_1 = arith.constant 0 : index
    %c0_2 = arith.constant 0 : index
    %2 = vector.load %arg1[%c0, %c0_1, %c0_2] : memref<5x8x4xbf16, #tpu.memory_space<vmem>>, vector<1x8x4xbf16>
    %3 = vector.shape_cast %2 : vector<1x8x4xbf16> to vector<8x4xbf16>
    %c0_3 = arith.constant 0 : index
    %c0_4 = arith.constant 0 : index
    %c0_5 = arith.constant 0 : index
    %4 = vector.load %arg3[%c0_3, %c0_4, %c0_5] : memref<1x4x128xbf16, #tpu.memory_space<vmem>>, vector<1x4x96xbf16>
    %5 = vector.shape_cast %4 : vector<1x4x96xbf16> to vector<4x96xbf16>
    %c0_6 = arith.constant 0 : index
    %c0_7 = arith.constant 0 : index
    %c0_8 = arith.constant 0 : index
    %6 = vector.load %arg4[%c0_6, %c0_7, %c0_8] : memref<1x4x128xbf16, #tpu.memory_space<vmem>>, vector<1x4x96xbf16>
    %7 = vector.shape_cast %6 : vector<1x4x96xbf16> to vector<4x96xbf16>
    %cst_9 = arith.constant dense<0.000000e+00> : vector<8x96xf32>
    %8 = tpu.matmul %3, %5, %cst_9 {dimension_numbers = #tpu.dot_dimension_numbers<[1], [0], [0], [1], [0, 0, 1, 1], [], []>} : vector<8x4xbf16>, vector<4x96xbf16>, vector<8x96xf32> -> vector<8x96xf32>
    %9 = arith.addf %0, %8 : vector<8x96xf32>
    %cst_10 = arith.constant dense<0.000000e+00> : vector<8x96xf32>
    %10 = tpu.matmul %3, %7, %cst_10 {dimension_numbers = #tpu.dot_dimension_numbers<[1], [0], [0], [1], [0, 0, 1, 1], [], []>} : vector<8x4xbf16>, vector<4x96xbf16>, vector<8x96xf32> -> vector<8x96xf32>
    %11 = arith.addf %1, %10 : vector<8x96xf32>
    %c1 = arith.constant 1 : index
    %c0_11 = arith.constant 0 : index
    %c0_12 = arith.constant 0 : index
    %12 = vector.load %arg1[%c1, %c0_11, %c0_12] : memref<5x8x4xbf16, #tpu.memory_space<vmem>>, vector<1x8x4xbf16>
    %13 = vector.shape_cast %12 : vector<1x8x4xbf16> to vector<8x4xbf16>
    %c0_13 = arith.constant 0 : index
    %c0_14 = arith.constant 0 : index
    %c0_15 = arith.constant 0 : index
    %14 = vector.load %arg4[%c0_13, %c0_14, %c0_15] : memref<1x4x128xbf16, #tpu.memory_space<vmem>>, vector<1x4x96xbf16>
    %15 = vector.shape_cast %14 : vector<1x4x96xbf16> to vector<4x96xbf16>
    %c0_16 = arith.constant 0 : index
    %c0_17 = arith.constant 0 : index
    %c16 = arith.constant 16 : index
    %16 = vector.load %arg3[%c0_16, %c0_17, %c16] : memref<1x4x128xbf16, #tpu.memory_space<vmem>>, vector<1x4x96xbf16>
    %17 = vector.shape_cast %16 : vector<1x4x96xbf16> to vector<4x96xbf16>
    %cst_18 = arith.constant dense<0.000000e+00> : vector<8x96xf32>
    %18 = tpu.matmul %13, %15, %cst_18 {dimension_numbers = #tpu.dot_dimension_numbers<[1], [0], [0], [1], [0, 0, 1, 1], [], []>} : vector<8x4xbf16>, vector<4x96xbf16>, vector<8x96xf32> -> vector<8x96xf32>
    %19 = arith.addf %9, %18 : vector<8x96xf32>
    %cst_19 = arith.constant dense<0.000000e+00> : vector<8x96xf32>
    %20 = tpu.matmul %13, %17, %cst_19 {dimension_numbers = #tpu.dot_dimension_numbers<[1], [0], [0], [1], [0, 0, 1, 1], [], []>} : vector<8x4xbf16>, vector<4x96xbf16>, vector<8x96xf32> -> vector<8x96xf32>
    %21 = arith.addf %11, %20 : vector<8x96xf32>
    %c2 = arith.constant 2 : index
    %c0_20 = arith.constant 0 : index
    %c0_21 = arith.constant 0 : index
    %22 = vector.load %arg1[%c2, %c0_20, %c0_21] : memref<5x8x4xbf16, #tpu.memory_space<vmem>>, vector<1x8x4xbf16>
    %23 = vector.shape_cast %22 : vector<1x8x4xbf16> to vector<8x4xbf16>
    %c0_22 = arith.constant 0 : index
    %c0_23 = arith.constant 0 : index
    %c16_24 = arith.constant 16 : index
    %24 = vector.load %arg3[%c0_22, %c0_23, %c16_24] : memref<1x4x128xbf16, #tpu.memory_space<vmem>>, vector<1x4x96xbf16>
    %25 = vector.shape_cast %24 : vector<1x4x96xbf16> to vector<4x96xbf16>
    %c0_25 = arith.constant 0 : index
    %c0_26 = arith.constant 0 : index
    %c16_27 = arith.constant 16 : index
    %26 = vector.load %arg4[%c0_25, %c0_26, %c16_27] : memref<1x4x128xbf16, #tpu.memory_space<vmem>>, vector<1x4x96xbf16>
    %27 = vector.shape_cast %26 : vector<1x4x96xbf16> to vector<4x96xbf16>
    %cst_28 = arith.constant dense<0.000000e+00> : vector<8x96xf32>
    %28 = tpu.matmul %23, %25, %cst_28 {dimension_numbers = #tpu.dot_dimension_numbers<[1], [0], [0], [1], [0, 0, 1, 1], [], []>} : vector<8x4xbf16>, vector<4x96xbf16>, vector<8x96xf32> -> vector<8x96xf32>
    %29 = arith.addf %19, %28 : vector<8x96xf32>
    %cst_29 = arith.constant dense<0.000000e+00> : vector<8x96xf32>
    %30 = tpu.matmul %23, %27, %cst_29 {dimension_numbers = #tpu.dot_dimension_numbers<[1], [0], [0], [1], [0, 0, 1, 1], [], []>} : vector<8x4xbf16>, vector<4x96xbf16>, vector<8x96xf32> -> vector<8x96xf32>
    %31 = arith.addf %21, %30 : vector<8x96xf32>
    %c3 = arith.constant 3 : index
    %c0_30 = arith.constant 0 : index
    %c0_31 = arith.constant 0 : index
    %32 = vector.load %arg1[%c3, %c0_30, %c0_31] : memref<5x8x4xbf16, #tpu.memory_space<vmem>>, vector<1x8x4xbf16>
    %33 = vector.shape_cast %32 : vector<1x8x4xbf16> to vector<8x4xbf16>
    %c0_32 = arith.constant 0 : index
    %c0_33 = arith.constant 0 : index
    %c16_34 = arith.constant 16 : index
    %34 = vector.load %arg4[%c0_32, %c0_33, %c16_34] : memref<1x4x128xbf16, #tpu.memory_space<vmem>>, vector<1x4x96xbf16>
    %35 = vector.shape_cast %34 : vector<1x4x96xbf16> to vector<4x96xbf16>
    %c0_35 = arith.constant 0 : index
    %c0_36 = arith.constant 0 : index
    %c32 = arith.constant 32 : index
    %36 = vector.load %arg3[%c0_35, %c0_36, %c32] : memref<1x4x128xbf16, #tpu.memory_space<vmem>>, vector<1x4x96xbf16>
    %37 = vector.shape_cast %36 : vector<1x4x96xbf16> to vector<4x96xbf16>
    %cst_37 = arith.constant dense<0.000000e+00> : vector<8x96xf32>
    %38 = tpu.matmul %33, %35, %cst_37 {dimension_numbers = #tpu.dot_dimension_numbers<[1], [0], [0], [1], [0, 0, 1, 1], [], []>} : vector<8x4xbf16>, vector<4x96xbf16>, vector<8x96xf32> -> vector<8x96xf32>
    %39 = arith.addf %29, %38 : vector<8x96xf32>
    %cst_38 = arith.constant dense<0.000000e+00> : vector<8x96xf32>
    %40 = tpu.matmul %33, %37, %cst_38 {dimension_numbers = #tpu.dot_dimension_numbers<[1], [0], [0], [1], [0, 0, 1, 1], [], []>} : vector<8x4xbf16>, vector<4x96xbf16>, vector<8x96xf32> -> vector<8x96xf32>
    %41 = arith.addf %31, %40 : vector<8x96xf32>
    %c4 = arith.constant 4 : index
    %c0_39 = arith.constant 0 : index
    %c0_40 = arith.constant 0 : index
    %42 = vector.load %arg1[%c4, %c0_39, %c0_40] : memref<5x8x4xbf16, #tpu.memory_space<vmem>>, vector<1x8x4xbf16>
    %43 = vector.shape_cast %42 : vector<1x8x4xbf16> to vector<8x4xbf16>
    %c0_41 = arith.constant 0 : index
    %c0_42 = arith.constant 0 : index
    %c32_43 = arith.constant 32 : index
    %44 = vector.load %arg3[%c0_41, %c0_42, %c32_43] : memref<1x4x128xbf16, #tpu.memory_space<vmem>>, vector<1x4x96xbf16>
    %45 = vector.shape_cast %44 : vector<1x4x96xbf16> to vector<4x96xbf16>
    %c0_44 = arith.constant 0 : index
    %c0_45 = arith.constant 0 : index
    %c32_46 = arith.constant 32 : index
    %46 = vector.load %arg4[%c0_44, %c0_45, %c32_46] : memref<1x4x128xbf16, #tpu.memory_space<vmem>>, vector<1x4x96xbf16>
    %47 = vector.shape_cast %46 : vector<1x4x96xbf16> to vector<4x96xbf16>
    %cst_47 = arith.constant dense<0.000000e+00> : vector<8x96xf32>
    %48 = tpu.matmul %43, %45, %cst_47 {dimension_numbers = #tpu.dot_dimension_numbers<[1], [0], [0], [1], [0, 0, 1, 1], [], []>} : vector<8x4xbf16>, vector<4x96xbf16>, vector<8x96xf32> -> vector<8x96xf32>
    %49 = arith.addf %39, %48 : vector<8x96xf32>
    %cst_48 = arith.constant dense<0.000000e+00> : vector<8x96xf32>
    %50 = tpu.matmul %43, %47, %cst_48 {dimension_numbers = #tpu.dot_dimension_numbers<[1], [0], [0], [1], [0, 0, 1, 1], [], []>} : vector<8x4xbf16>, vector<4x96xbf16>, vector<8x96xf32> -> vector<8x96xf32>
    %51 = arith.addf %41, %50 : vector<8x96xf32>
    %52 = arith.maximumf %49, %51 : vector<8x96xf32>
    %c0_49 = arith.constant 0 : index
    %c0_50 = arith.constant 0 : index
    %53 = vector.load %arg2[%c0_49, %c0_50] : memref<8x1xf32, #tpu.memory_space<vmem>>, vector<8x1xf32>
    %54 = vector.broadcast %53 : vector<8x1xf32> to vector<8x96xf32>
    %55 = arith.addf %52, %54 : vector<8x96xf32>
    %cst_51 = arith.constant 0.000000e+00 : f32
    %56 = vector.broadcast %cst_51 : f32 to vector<8x96xf32>
    %57 = arith.maximumf %55, %56 : vector<8x96xf32>
    %c0_52 = arith.constant 0 : index
    %c0_53 = arith.constant 0 : index
    %c0_54 = arith.constant 0 : index
    %58 = vector.load %arg5[%c0_52, %c0_53, %c0_54] : memref<1x8x96xf32, #tpu.memory_space<vmem>>, vector<1x8x96xf32>
    %59 = vector.shape_cast %58 : vector<1x8x96xf32> to vector<8x96xf32>
    %60 = vector.shape_cast %57 : vector<8x96xf32> to vector<1x8x96xf32>
    tpu.vector_store %arg5[%c0_52, %c0_53, %c0_54], %60 {strides = array<i32>} : memref<1x8x96xf32, #tpu.memory_space<vmem>>, vector<1x8x96xf32>,
    %cst_55 = arith.constant dense<0.000000e+00> : vector<8xf32>
    %61 = vector.multi_reduction <add>, %57, %cst_55 [1] : vector<8x96xf32> to vector<8xf32>
    %62 = vector.shape_cast %61 : vector<8xf32> to vector<8x1xf32>
    %63 = arith.mulf %57, %57 : vector<8x96xf32>
    %cst_56 = arith.constant dense<0.000000e+00> : vector<8xf32>
    %64 = vector.multi_reduction <add>, %63, %cst_56 [1] : vector<8x96xf32> to vector<8xf32>
    %65 = vector.shape_cast %64 : vector<8xf32> to vector<8x1xf32>
    %66 = tpu.concatenate %62, %65 in 1 : vector<8x1xf32>, vector<8x1xf32> -> vector<8x2xf32>
    %c0_57 = arith.constant 0 : index
    %c0_58 = arith.constant 0 : index
    %c0_59 = arith.constant 0 : index
    %67 = vector.load %arg6[%c0_57, %c0_58, %c0_59] : memref<1x8x2xf32, #tpu.memory_space<vmem>>, vector<1x8x2xf32>
    %68 = vector.shape_cast %67 : vector<1x8x2xf32> to vector<8x2xf32>
    %69 = vector.shape_cast %66 : vector<8x2xf32> to vector<1x8x2xf32>
    tpu.vector_store %arg6[%c0_57, %c0_58, %c0_59], %69 {strides = array<i32>} : memref<1x8x2xf32, #tpu.memory_space<vmem>>, vector<1x8x2xf32>,
    return
  }
  func.func @transform_0(%arg0: i32) -> (i32, i32, i32) {
    %c0_i32 = arith.constant 0 : i32
    %c0_i32_0 = arith.constant 0 : i32
    %c0_i32_1 = arith.constant 0 : i32
    %c0_i32_2 = arith.constant 0 : i32
    return %c0_i32, %c0_i32_0, %c0_i32_1 : i32, i32, i32
  }
  func.func @transform_1(%arg0: i32) -> (i32, i32) {
    %c0_i32 = arith.constant 0 : i32
    %c0_i32_0 = arith.constant 0 : i32
    %c0_i32_1 = arith.constant 0 : i32
    return %c0_i32, %c0_i32_0 : i32, i32
  }
  func.func @transform_2(%arg0: i32) -> (i32, i32, i32) {
    %c0_i32 = arith.constant 0 : i32
    %c0_i32_0 = arith.constant 0 : i32
    %c0_i32_1 = arith.constant 0 : i32
    return %arg0, %c0_i32, %c0_i32_0 : i32, i32, i32
  }
  func.func @transform_3(%arg0: i32) -> (i32, i32, i32) {
    %c0_i32 = arith.constant 0 : i32
    %c0_i32_0 = arith.constant 0 : i32
    %c0_i32_1 = arith.constant 0 : i32
    return %arg0, %c0_i32, %c0_i32_0 : i32, i32, i32
  }
  func.func @transform_4(%arg0: i32) -> (i32, i32, i32) {
    %c0_i32 = arith.constant 0 : i32
    %c0_i32_0 = arith.constant 0 : i32
    %c0_i32_1 = arith.constant 0 : i32
    return %arg0, %c0_i32, %c0_i32_0 : i32, i32, i32
  }
  func.func @transform_5(%arg0: i32) -> (i32, i32, i32) {
    %c0_i32 = arith.constant 0 : i32
    %c0_i32_0 = arith.constant 0 : i32
    %c0_i32_1 = arith.constant 0 : i32
    return %arg0, %c0_i32, %c0_i32_0 : i32, i32, i32
  }
}

module attributes {stable_mosaic.version = 11 : i64} {
  func.func @_bn_apply_kernel(%arg0: i32, %arg1: memref<8x2xf32, #tpu.memory_space<vmem>>, %arg2: memref<1x8x96xf32, #tpu.memory_space<vmem>>, %arg3: memref<1x8x96xf32, #tpu.memory_space<vmem>>) attributes {dimension_semantics = [#tpu.dimension_semantics<parallel>], iteration_bounds = array<i64: 2>, scalar_prefetch = 0 : i64, scratch_operands = 0 : i64, tpu.core_type = #tpu.core_type<tc>, window_params = [{pipeline_mode = #tpu.pipeline_mode<synchronous>, transform_indices = @transform_0, window_bounds = array<i64: 8, 2>}, {transform_indices = @transform_1, window_bounds = array<i64: 1, 8, 96>}, {transform_indices = @transform_2, window_bounds = array<i64: 1, 8, 96>}]} {
    %c0 = arith.constant 0 : index
    %c0_0 = arith.constant 0 : index
    %c0_1 = arith.constant 0 : index
    %0 = vector.load %arg2[%c0, %c0_0, %c0_1] : memref<1x8x96xf32, #tpu.memory_space<vmem>>, vector<1x8x96xf32>
    %1 = vector.shape_cast %0 : vector<1x8x96xf32> to vector<8x96xf32>
    %c0_2 = arith.constant 0 : index
    %c0_3 = arith.constant 0 : index
    %2 = vector.load %arg1[%c0_2, %c0_3] : memref<8x2xf32, #tpu.memory_space<vmem>>, vector<8x1xf32>
    %3 = vector.broadcast %2 : vector<8x1xf32> to vector<8x96xf32>
    %4 = arith.mulf %1, %3 : vector<8x96xf32>
    %c0_4 = arith.constant 0 : index
    %c1 = arith.constant 1 : index
    %5 = vector.load %arg1[%c0_4, %c1] : memref<8x2xf32, #tpu.memory_space<vmem>>, vector<8x1xf32>
    %6 = vector.broadcast %5 : vector<8x1xf32> to vector<8x96xf32>
    %7 = arith.addf %4, %6 : vector<8x96xf32>
    %c0_5 = arith.constant 0 : index
    %c0_6 = arith.constant 0 : index
    %c0_7 = arith.constant 0 : index
    %8 = vector.load %arg3[%c0_5, %c0_6, %c0_7] : memref<1x8x96xf32, #tpu.memory_space<vmem>>, vector<1x8x96xf32>
    %9 = vector.shape_cast %8 : vector<1x8x96xf32> to vector<8x96xf32>
    %10 = vector.shape_cast %7 : vector<8x96xf32> to vector<1x8x96xf32>
    tpu.vector_store %arg3[%c0_5, %c0_6, %c0_7], %10 {strides = array<i32>} : memref<1x8x96xf32, #tpu.memory_space<vmem>>, vector<1x8x96xf32>,
    return
  }
  func.func @transform_0(%arg0: i32) -> (i32, i32) {
    %c0_i32 = arith.constant 0 : i32
    %c0_i32_0 = arith.constant 0 : i32
    %c0_i32_1 = arith.constant 0 : i32
    return %c0_i32, %c0_i32_0 : i32, i32
  }
  func.func @transform_1(%arg0: i32) -> (i32, i32, i32) {
    %c0_i32 = arith.constant 0 : i32
    %c0_i32_0 = arith.constant 0 : i32
    %c0_i32_1 = arith.constant 0 : i32
    return %arg0, %c0_i32, %c0_i32_0 : i32, i32, i32
  }
  func.func @transform_2(%arg0: i32) -> (i32, i32, i32) {
    %c0_i32 = arith.constant 0 : i32
    %c0_i32_0 = arith.constant 0 : i32
    %c0_i32_1 = arith.constant 0 : i32
    return %arg0, %c0_i32, %c0_i32_0 : i32, i32, i32
  }
}

</mosaic_0001>

<bundles_post_ra>
// kernel: conv_block.3
= control target key start
LH: loop header
LB: loop body
LE: loop exit
PB: predicated region body
PF: predicated region fallthrough
CT: control target
= control target key end

     0   :  { %s253_s9 = smov 0   ;;  %s267_s0 = inlined_call_operand.vmem [shape: f32[8,2], index: 0, kind: input, shape index: {}]   ;;  %s268_s1 = inlined_call_operand.vmem [shape: f32[2,8,96], index: 1, kind: input, shape index: {}]   ;;  %s269_s2 = inlined_call_operand.vmem [shape: f32[2,8,96], index: 2, kind: output, shape index: {}]  }
   0x1 LB: > { %s207_s10 = sadd.s32 4294967295, %s234_s9   ;;  %p211_p0 = scmp.ge.s32.totalorder %s234_s9, 1  ;;  %s234_s9 = sphi %s253_s9, %s12_s9  }
   0x2   : > { %p111_p1 = scmp.lt.s32.totalorder %s234_s9, 3 }
   0x4   : > { %p112_p2 = pnand %p211_p0, %p111_p1 }
   0x5   : > { %p131_p3 = scmp.lt.s32.totalorder (!%p112_p2), %s207_s10, 1 }
   0x6   : > { %115 = sbr.rel (%p112_p2) target bundleno = 145 (0x91), region = 28 }
   0xb   : > { %v140_v0 = vld [vmem:[%s267_s0] sm:$0xff]  ;;  %v236_v1 = vmov 0   ;;  %v237_v2 = vmov 1   ;;  %s271_s10 = smov (!%p131_p3, %s207_s10), 1  ;;  %vm152_vm0 = vcmask 785408  }
   0xc   : > { %226 = vset.pattern.permute.xlu0 %v236_v1  ;;  %s212_s13 = sshll.u32 %s271_s10, 3 }
   0xd   : > { %143 = vperm.xlu0 %226, %v140_v0   ;;  %s134_s16 = scalar_lea.vmem %s268_s1, %s212_s13  ;;  %s138_s19 = scalar_lea.vmem %s269_s2, %s212_s13 }
   0xe   : > { %v139_v4 = vld [vmem:[%s134_s16] sm:$0xff] }
  0x11   : > { %227 = vset.pattern.permute.xlu0 %v237_v2 }
  0x12   : > { %148 = vperm.xlu0 %227, %v140_v0  }
  0x88   : > { %v144_v3 = vpop.permute.xlu0 %143 }
  0x89   : > { %v146_v5 = vmul.f32 %v144_v3, %v139_v4 }
  0x8d   : > { %v149_v6 = vpop.permute.xlu0 %148 }
  0x8e   : > { %v151_v7 = vadd.f32 %v149_v6, %v146_v5 }
  0x90   : > { %153 = vst.msk [vmem:[%s138_s19] sm:$0xff] %vm152_vm0, %v151_v7 }
  0x91 PF: > { %s12_s9 = sadd.s32 1, %s234_s9  }
  0x92   : > { %p9_p4 = scmp.ge.s32.totalorder %s12_s9, 4  }
  0x94   :  { %11 = sbr.rel (!%p9_p4) target bundleno = 1 (0x1), region = 58 }

// kernel: conv_block.2
= control target key start
LH: loop header
LB: loop body
LE: loop exit
PB: predicated region body
PF: predicated region fallthrough
CT: control target
= control target key end

     0   :  { %s1029_s18 = smov 0   ;;  %s1120_s0 = inlined_call_operand.vmem [shape: bf16[5,8,4], index: 0, kind: input, shape index: {}]   ;;  %s1121_s1 = inlined_call_operand.vmem [shape: f32[8,1], index: 1, kind: input, shape index: {}]   ;;  %s1122_s2 = inlined_call_operand.vmem [shape: bf16[2,4,128], index: 2, kind: input, shape index: {}]   ;;  %s1123_s3 = inlined_call_operand.vmem [shape: bf16[2,4,128], index: 3, kind: input, shape index: {}]   ;;  %s1124_s4 = inlined_call_operand.vmem [shape: f32[2,8,96], index: 4, kind: output, shape index: {0}]   ;;  %s1125_s5 = inlined_call_operand.vmem [shape: f32[2,8,2], index: 5, kind: output, shape index: {1}]  }
   0x1 LB: > { %s862_s19 = sadd.s32 4294967295, %s991_s18   ;;  %p866_p0 = scmp.ge.s32.totalorder %s991_s18, 1  ;;  %s991_s18 = sphi %s1029_s18, %s16_s18  }
   0x2   : > { %p198_p1 = scmp.lt.s32.totalorder %s991_s18, 3 }
   0x4   : > { %p199_p2 = pnand %p866_p0, %p198_p1 }
   0x5   : > { %p232_p3 = scmp.lt.s32.totalorder (!%p199_p2), %s862_s19, 1  ;;  %s996_s27 = smov (!%p199_p2), 96  }
   0x6   : > { %202 = sbr.rel (%p199_p2) target bundleno = 507 (0x1fb), region = 36  ;;  %s997_s30 = smov (!%p199_p2), 112  }
   0xb   : > { %v352_v0 = vlaneseq  ;;  %v993_v1 = vmov 1983009808   ;;  %v994_v3 = vmov 0.0   ;;  %s1127_s19 = smov (!%p232_p3, %s862_s19), 1  ;;  %vm995_vm0 = vmmov 0   ;;  %v745_v16 = vld [vmem:[%s1121_s1] sm:$0xff] }
   0xc   : > { %v350_v2 = vunpack.c.l.s4 %v993_v1  ;;  %916 = vmatprep.subr.bf16.mxu1 %v994_v3  ;;  %910 = vmatprep.subr.bf16.mxu0 %v994_v3  ;;  %s867_s20 = sshll.u32 %s1127_s19, 1  ;;  %vm258_vm1 = vcmask 1041408   ;;  %v249_v12 = vld [vmem:[%s1120_s0] sm:$0xf]  ;;  %vm254_vm2 = vcmask 31744   ;;  %v998_v17 = vmov 0  }
   0xd   : > { %v353_v4 = vshrl.u32 %v352_v0, 7  ;;  %918 = vmatprep.mubr.msk.bf16.mxu1 %vm995_vm0, %v994_v3  ;;  %912 = vmatprep.mubr.msk.bf16.mxu0 %vm995_vm0, %v994_v3  ;;  %s235_s23 = scalar_lea.vmem %s1122_s2, %s867_s20  ;;  %s239_s26 = scalar_lea.vmem %s1123_s3, %s867_s20  ;;  %v871_v15 = vld [vmem:[%s1120_s0 + $0x4] sm:$0xf]  ;;  %v876_v23 = vld [vmem:[%s1120_s0 + $0x8] sm:$0xf]  ;;  %vm753_vm3 = vcmask 785408  }
   0xe   : > { %v351_v5 = vunpack.c.0.s8 %v350_v2  ;;  %v250_v7 = vld [vmem:[%s235_s23] sm:$0x3]  ;;  %984 = vset.pattern.permute.xlu0 %v998_v17  ;;  %v880_v26 = vld [vmem:[%s1120_s0 + $0xc] sm:$0xf]  ;;  %v884_v28 = vld [vmem:[%s1120_s0 + $0x10] sm:$0xf] }
   0xf   : > { %v882_v9 = vld.sshfl [vmem:[%s235_s23] sm:$0x3 pattern:$0x76325410]  ;;  %v306_v10 = vsel %vm258_vm1, %v250_v7, 0  ;;  %s869_s16 = sshll.u32 %s1127_s19, 3 }
  0x10   : > { %v354_v6 = vsub.s32 %v351_v5, %v353_v4  ;;  %597 = vrot.lane.b32.xlu1 %v882_v9, %s996_s27  ;;  %917 = vmatpush3.bf16.msra.mxu1 %v306_v10  ;;  %v251_v11 = vld [vmem:[%s239_s26] sm:$0x3]  ;;  %s243_s21 = scalar_lea.vmem %s1124_s4, %s869_s16  ;;  %vm762_vm4 = vcmask 7168   ;;  %s247_s19 = scalar_lea.vmem %s1125_s5, %s869_s16  ;;  %vm764_vm5 = vcmask 15360  }
  0x11   : > { %v260_v13 = vsel %vm258_vm1, %v251_v11, 0  ;;  %928 = vmatprep.subr.bf16.mxu1 %v994_v3  ;;  %v878_v14 = vld.sshfl [vmem:[%s239_s26] sm:$0x3 pattern:$0x76325410] }
  0x12   : > { %v355_v8 = vrot.slane %v250_v7, %v354_v6  ;;  %911 = vmatpush3.bf16.msra.mxu0 %v260_v13 }
  0x13   : > { %919 = vmatmul.mubr.msk.bf16.vlgmr.msra.gmra.mxu1 %vm254_vm2, %v249_v12  ;;  %922 = vmatprep.subr.bf16.mxu0 %v994_v3 }
  0x14   : > { %356 = vrot.lane.b32.xlu0 %v355_v8, %s997_s30  ;;  %698 = vrot.lane.b32.xlu1 %v878_v14, %s996_s27 }
  0x15   : > { %929 = vmatpush3.bf16.msra.mxu1 %v260_v13  ;;  %913 = vmatmul.mubr.msk.bf16.vlgmr.msra.gmra.mxu0 %vm254_vm2, %v871_v15 }
  0x16   : > { %930 = vmatprep.mubr.msk.bf16.mxu1 %vm995_vm0, %v994_v3  ;;  %924 = vmatprep.mubr.msk.bf16.mxu0 %vm995_vm0, %v994_v3 }
  0x17   : > { %940 = vmatprep.subr.bf16.mxu1 %v994_v3 }
  0x18   : > { %496 = vrot.lane.b32.xlu0 %v878_v14, %s997_s30 }
  0x1b   : > { %931 = vmatmul.mubr.msk.bf16.vlgmr.msra.gmra.mxu1 %vm254_vm2, %v249_v12 }
  0x1c   : > { %942 = vmatprep.mubr.msk.bf16.mxu1 %vm995_vm0, %v994_v3  ;;  %748 = vperm.xlu0 %984, %v745_v16  }
  0x82   : > { %v598_v21 = vpop.permute.xlu1 %597 }
  0x83   : > { %v600_v24 = vsel %vm258_vm1, %v598_v21, 0 }
  0x86   : > { %v357_v18 = vpop.permute.xlu0 %356  ;;  %v699_v25 = vpop.permute.xlu1 %698 }
  0x87   : > { %v359_v19 = vsel %vm258_vm1, %v357_v18, 0  ;;  %v701_v27 = vsel %vm258_vm1, %v699_v25, 0 }
  0x88   : > { %923 = vmatpush3.bf16.msra.mxu0 %v359_v19 }
  0x89   : > { %934 = vmatprep.subr.bf16.mxu0 %v994_v3 }
  0x8a   : > { %v497_v20 = vpop.permute.xlu0 %496 }
  0x8b   : > { %v499_v22 = vsel %vm258_vm1, %v497_v20, 0  ;;  %925 = vmatmul.mubr.msk.bf16.vlgmr.msra.gmra.mxu0 %vm254_vm2, %v871_v15 }
  0x8c   : > { %935 = vmatpush3.bf16.msra.mxu0 %v359_v19  ;;  %941 = vmatpush3.bf16.msra.mxu1 %v499_v22 }
  0x8d   : > { %936 = vmatprep.mubr.msk.bf16.mxu0 %vm995_vm0, %v994_v3  ;;  %946 = vmatprep.subr.bf16.mxu0 %v994_v3 }
  0x8e   : > { %952 = vmatprep.subr.bf16.mxu1 %v994_v3 }
  0x8f   : > { %943 = vmatmul.mubr.msk.bf16.vlgmr.msra.gmra.mxu1 %vm254_vm2, %v876_v23 }
  0x90   : > { %953 = vmatpush3.bf16.msra.mxu1 %v600_v24  ;;  %954 = vmatprep.mubr.msk.bf16.mxu1 %vm995_vm0, %v994_v3 }
  0x91   : > { %964 = vmatprep.subr.bf16.mxu1 %v994_v3 }
  0x93   : > { %937 = vmatmul.mubr.msk.bf16.vlgmr.msra.gmra.mxu0 %vm254_vm2, %v876_v23 }
  0x94   : > { %947 = vmatpush3.bf16.msra.mxu0 %v499_v22  ;;  %948 = vmatprep.mubr.msk.bf16.mxu0 %vm995_vm0, %v994_v3 }
  0x95   : > { %958 = vmatprep.subr.bf16.mxu0 %v994_v3 }
  0x97   : > { %955 = vmatmul.mubr.msk.bf16.vlgmr.msra.gmra.mxu1 %vm254_vm2, %v880_v26  ;;  %v749_v9 = vpop.permute.xlu0 %748 }
  0x98   : > { %965 = vmatpush3.bf16.msra.mxu1 %v701_v27  ;;  %966 = vmatprep.mubr.msk.bf16.mxu1 %vm995_vm0, %v994_v3 }
  0x9b   : > { %949 = vmatmul.mubr.msk.bf16.vlgmr.msra.gmra.mxu0 %vm254_vm2, %v880_v26 }
  0x9c   : > { %959 = vmatpush3.bf16.msra.mxu0 %v600_v24  ;;  %960 = vmatprep.mubr.msk.bf16.mxu0 %vm995_vm0, %v994_v3 }
  0x9f   : > { %967 = vmatmul.mubr.msk.bf16.vlgmr.msra.gmra.mxu1 %vm254_vm2, %v884_v28 }
  0xa3   : > { %961 = vmatmul.mubr.msk.bf16.vlgmr.msra.gmra.mxu0 %vm254_vm2, %v884_v28 }
  0xd3   : > { %v342_v29 = vpop.f32.mrf.mxu1 }
  0xd5   : > { %v920_v30 = vpop.f32.mrf.mxu1  ;;  %v296_v31 = vpop.f32.mrf.mxu0 }
  0xd6   : > { %v343_v32 = vadd.f32 %v342_v29, %v296_v31 }
  0xd7   : > { %v345_v33 = vpop.f32.mrf.mxu1  ;;  %v914_v34 = vpop.f32.mrf.mxu0 }
  0xd9   : > { %v921_v35 = vpop.f32.mrf.mxu1  ;;  %v299_v36 = vpop.f32.mrf.mxu0 }
  0xdb   : > { %v435_v37 = vpop.f32.mrf.mxu1  ;;  %v915_v38 = vpop.f32.mrf.mxu0 }
  0xdd   : > { %v932_v39 = vpop.f32.mrf.mxu1 }
  0xdf   : > { %v438_v40 = vpop.f32.mrf.mxu1 }
  0xe1   : > { %v933_v41 = vpop.f32.mrf.mxu1 }
 0x14b   : > { %v395_v42 = vpop.f32.mrf.mxu0 }
 0x14c   : > { %v436_v60 = vadd.f32 %v435_v37, %v395_v42 }
 0x14d   : > { %v926_v43 = vpop.f32.mrf.mxu0 }
 0x14f   : > { %v398_v44 = vpop.f32.mrf.mxu0  ;;  %v535_v45 = vpop.f32.mrf.mxu1 }
 0x150   : > { %v541_v63 = vadd.f32 %v535_v45, %v436_v60 }
 0x151   : > { %v927_v46 = vpop.f32.mrf.mxu0  ;;  %v944_v47 = vpop.f32.mrf.mxu1 }
 0x153   : > { %v481_v48 = vpop.f32.mrf.mxu0  ;;  %v538_v49 = vpop.f32.mrf.mxu1 }
 0x154   : > { %v487_v0 = vadd.f32 %v481_v48, %v343_v32 }
 0x155   : > { %v938_v50 = vpop.f32.mrf.mxu0  ;;  %v945_v51 = vpop.f32.mrf.mxu1 }
 0x157   : > { %v484_v52 = vpop.f32.mrf.mxu0  ;;  %v636_v53 = vpop.f32.mrf.mxu1 }
 0x158   : > { %v642_v3 = vadd.f32 %v636_v53, %v541_v63 }
 0x159   : > { %v939_v54 = vpop.f32.mrf.mxu0  ;;  %v956_v55 = vpop.f32.mrf.mxu1 }
 0x15b   : > { %v582_v56 = vpop.f32.mrf.mxu0  ;;  %v639_v57 = vpop.f32.mrf.mxu1 }
 0x15c   : > { %v588_v4 = vadd.f32 %v582_v56, %v487_v0 }
 0x15d   : > { %v950_v58 = vpop.f32.mrf.mxu0  ;;  %v957_v59 = vpop.f32.mrf.mxu1 }
 0x15f   : > { %v585_v61 = vpop.f32.mrf.mxu0  ;;  %v737_v62 = vpop.f32.mrf.mxu1 }
 0x160   : > { %v743_v7 = vadd.f32 %v737_v62, %v642_v3 }
 0x161   : > { %v951_v1 = vpop.f32.mrf.mxu0  ;;  %v968_v2 = vpop.f32.mrf.mxu1 }
 0x163   : > { %v683_v5 = vpop.f32.mrf.mxu0  ;;  %v740_v6 = vpop.f32.mrf.mxu1 }
 0x164   : > { %v689_v8 = vadd.f32 %v683_v5, %v588_v4 }
 0x165   : > { %v962_v10 = vpop.f32.mrf.mxu0  ;;  %v969_v11 = vpop.f32.mrf.mxu1 }
 0x166   : > { %v744_v12 = vmax.f32 %v689_v8, %v743_v7 }
 0x167   : > { %v686_v13 = vpop.f32.mrf.mxu0 }
 0x168   : > { %v751_v14 = vadd.f32 %v749_v9, %v744_v12 }
 0x169   : > { %v963_v15 = vpop.f32.mrf.mxu0 }
 0x16a   : > { %v752_v16 = vmax.f32 %v751_v14, 0.0 }
 0x16c   : > { %v755_v17 = vsel %vm753_vm3, %v752_v16, 0.0  ;;  %754 = vst.msk [vmem:[%s243_s21] sm:$0xff] %vm753_vm3, %v752_v16  ;;  %v758_v18 = vmul.f32 %v752_v16, %v752_v16 }
 0x16d   : > { %756 = vadd.xlane.f32.xlu1 %v755_v17 }
 0x16e   : > { %v759_v19 = vsel %vm753_vm3, %v758_v18, 0.0 }
 0x16f   : > { %760 = vadd.xlane.f32.xlu0 %v759_v19 }
 0x1f6   : > { %v757_v20 = vpop.xlane.xlu1 %756 }
 0x1f8   : > { %v761_v21 = vpop.xlane.xlu0 %760 }
 0x1f9   : > { %v763_v22 = vsel %vm762_vm4, %v757_v20, %v761_v21 }
 0x1fa   : > { %765 = vst.msk [vmem:[%s247_s19] sm:$0xff] %vm764_vm5, %v763_v22 }
 0x1fb PF: > { %s16_s18 = sadd.s32 1, %s991_s18  }
 0x1fc   : > { %p13_p4 = scmp.ge.s32.totalorder %s16_s18, 4  }
 0x1fe   :  { %15 = sbr.rel (!%p13_p4) target bundleno = 1 (0x1), region = 85 }

</bundles_post_ra>
